<compile_context>
chip_gen: v6e
topology: v6e:2x2x1
jax: 0.10.0
libtpu: 0.0.40
codegen_flags: <defaults>
</compile_context>

<pallas_src>
import functools
import numpy as np
import jax
import jax.numpy as jnp
from jax.experimental import pallas as pl
from jax.experimental.pallas import tpu as pltpu

HIGHEST = jax.lax.Precision.HIGHEST


def _round_up(x, m):
    return (x + m - 1) // m * m


# ------------------------------ Pallas kernel ------------------------------- #
def psnet_kernel(x_ref, w_in_ref,
                 t1_ref, s1_ref, b1_ref,
                 t2_ref, s2_ref, b2_ref,
                 t3_ref, s3_ref, b3_ref,
                 w_out_ref, b_out_ref,
                 out_ref):
    # in_layer (Linear, no bias): (BT, 2*sd) @ (2*sd, inner) -> (BT, inner)
    h = jnp.dot(x_ref[...], w_in_ref[...], preferred_element_type=jnp.float32)

    def conv_bn_relu(x, t_ref, s_ref, b_ref):
        # Conv1d(k=3, 'same') as a channel-major Toeplitz matmul; BN (eval mode)
        # folded to a per-lane scale/shift.
        y = jnp.dot(x, t_ref[...], preferred_element_type=jnp.float32)
        return jnp.maximum(y * s_ref[...] + b_ref[...], 0.0)

    x1 = conv_bn_relu(h,  t1_ref, s1_ref, b1_ref)   # (BT, nf*inner)
    x2 = conv_bn_relu(x1, t2_ref, s2_ref, b2_ref)   # (BT, nf*inner)
    x3 = conv_bn_relu(x2, t3_ref, s3_ref, b3_ref)   # (BT, nf*inner)

    # out_layer: single (BT, nf*inner) @ (nf*inner, fr_pad) + bias (lane-dense).
    out_ref[...] = jnp.dot(x3, w_out_ref[...],
                           preferred_element_type=jnp.float32) + b_out_ref[...]


# -------------------------------- wrapper ----------------------------------- #
_PARAM_ORDER = ("w_in", "t1", "s1", "b1", "t2", "s2", "b2",
                "t3", "s3", "b3", "w_out", "b_out")


@functools.partial(jax.jit, static_argnums=(2,))
def psnet_forward(inp, kp, fr_size):
    B = inp.shape[0]
    x = inp.reshape(B, -1).astype(jnp.float32)          # view(bsz, -1)
    two_sd = x.shape[1]
    fr_pad = kp["w_out"].shape[1]

    # Batch tile: big enough to fill the MXU at real batch sizes, rounded to the
    # 8-sublane granule for tiny demo batches.
    BT = 256 if B >= 256 else max(8, _round_up(B, 8))
    B_pad = _round_up(B, BT)
    if B_pad != B:
        x = jnp.pad(x, ((0, B_pad - B), (0, 0)))

    def wspec(arr):  # full-array block, constant index -> fetched once, reused.
        return pl.BlockSpec(arr.shape, lambda b, _n=arr.ndim: (0,) * _n)

    in_specs = [pl.BlockSpec((BT, two_sd), lambda b: (b, 0))]
    in_specs += [wspec(kp[name]) for name in _PARAM_ORDER]
    out_spec = pl.BlockSpec((BT, fr_pad), lambda b: (b, 0))

    fn = pl.pallas_call(
        psnet_kernel,
        out_shape=jax.ShapeDtypeStruct((B_pad, fr_pad), jnp.float32),
        grid_spec=pltpu.PrefetchScalarGridSpec(
            num_scalar_prefetch=0,
            grid=(B_pad // BT,),
            in_specs=in_specs,
            out_specs=out_spec),
        compiler_params=pltpu.CompilerParams(
            dimension_semantics=("parallel",)),
    )
    out = fn(x, *[kp[name] for name in _PARAM_ORDER])
    return out[:B, :fr_size]


# ----------------------- deterministic parameter init ----------------------- #
def _conv_toeplitz(w, L):
    """w: (Cout, Cin, K) PyTorch Conv1d weight (no bias). Returns T of shape
    (Cin*L, Cout*L) such that y_flat = x_flat @ T reproduces padding='same'
    (zero-padded edges) with channel-major flattening (PyTorch .view order)."""
    w = np.asarray(w, np.float32)
    cout, cin, K = w.shape
    pad = K // 2
    T = np.zeros((cin * L, cout * L), np.float32)
    lo = np.arange(L)
    for k in range(K):
        li = lo + (k - pad)
        valid = (li >= 0) & (li < L)
        for co in range(cout):
            for ci in range(cin):
                T[ci * L + li[valid], co * L + lo[valid]] = w[co, ci, k]
    return jnp.asarray(T)


def init_params(key, *, signal_dim, inner_dim, n_filters, fr_size,
                kernel_size=3, n_layers=3, eps=1e-5):
    keys = iter(jax.random.split(key, 32))
    nk = lambda: next(keys)

    # in_layer: PyTorch weight is (inner, 2*sd); store the transpose.
    w_in = 0.1 * jax.random.normal(nk(), (2 * signal_dim, inner_dim), jnp.float32)
    kparams = {"w_in": w_in}
    tparams = {"w_in": w_in}

    cin = 1
    for n in range(n_layers):
        w = 0.3 * jax.random.normal(nk(), (n_filters, cin, kernel_size), jnp.float32)
        gamma = 1.0 + 0.1 * jax.random.normal(nk(), (n_filters,), jnp.float32)
        beta = 0.1 * jax.random.normal(nk(), (n_filters,), jnp.float32)
        mean = 0.05 * jax.random.normal(nk(), (n_filters,), jnp.float32)
        var = 1.0 + 0.1 * jax.random.uniform(nk(), (n_filters,), jnp.float32)
        # TODO(synk): BatchNorm1d implemented in eval mode (running stats folded
        # into scale/shift); training-mode batch statistics are not modeled.
        scale = gamma / jnp.sqrt(var + eps)
        shift = beta - mean * scale

        kparams[f"t{n + 1}"] = _conv_toeplitz(w, inner_dim)                 # (Cin*L, Cout*L)
        kparams[f"s{n + 1}"] = jnp.repeat(scale, inner_dim).reshape(1, -1)  # (1, Cout*L)
        kparams[f"b{n + 1}"] = jnp.repeat(shift, inner_dim).reshape(1, -1)  # (1, Cout*L)
        tparams[f"conv{n}"] = w
        tparams[f"bn{n}"] = (scale, shift)
        cin = n_filters

    # out_layer: PyTorch weight (fr, nf*inner); store transposed and pad fr to a
    # multiple of 128 so the output store is lane-dense.
    w_out = 0.05 * jax.random.normal(nk(), (n_filters * inner_dim, fr_size), jnp.float32)
    b_out = 0.1 * jax.random.normal(nk(), (fr_size,), jnp.float32)
    fr_pad = _round_up(fr_size, 128)
    kparams["w_out"] = jnp.pad(w_out, ((0, 0), (0, fr_pad - fr_size)))
    kparams["b_out"] = jnp.pad(b_out, (0, fr_pad - fr_size)).reshape(1, fr_pad)
    tparams["w_out"] = w_out
    tparams["b_out"] = b_out
    return kparams, tparams


# ------------------------------ JAX reference -------------------------------- #
def psnet_reference(inp, tp, n_layers=3):
    B = inp.shape[0]
    x = jnp.dot(inp.reshape(B, -1).astype(jnp.float32), tp["w_in"], precision=HIGHEST)
    x = x[:, None, :]                                                  # (B, 1, inner)
    for n in range(n_layers):
        x = jax.lax.conv_general_dilated(
            x, tp[f"conv{n}"], window_strides=(1,), padding="SAME",
            dimension_numbers=("NCH", "OIH", "NCH"), precision=HIGHEST)
        scale, shift = tp[f"bn{n}"]
        x = jnp.maximum(x * scale[None, :, None] + shift[None, :, None], 0.0)
    x = x.reshape(B, -1)
    return jnp.dot(x, tp["w_out"], precision=HIGHEST) + tp["b_out"]


# ----------------------------------- main ------------------------------------ #
if __name__ == "__main__":
    # Small shapes consistent with the module's forward: inp is (batch, 2, signal_dim).
    batch, signal_dim, inner_dim, n_filters, fr_size = 2, 8, 32, 8, 64

    root = jax.random.PRNGKey(0)
    k_inp, k_par = jax.random.split(root)
    inp = jax.random.normal(k_inp, (batch, 2, signal_dim), jnp.float32)
    kparams, tparams = init_params(
        k_par, signal_dim=signal_dim, inner_dim=inner_dim,
        n_filters=n_filters, fr_size=fr_size)

    out = jax.block_until_ready(psnet_forward(inp, kparams, fr_size))
    ref = jax.block_until_ready(psnet_reference(inp, tparams))

    # Kernel matmuls use default (bf16-input, f32-accumulate) MXU precision while
    # the reference is full-f32 HIGHEST, hence the looser tolerance.
    np.testing.assert_allclose(np.asarray(out), np.asarray(ref),
                               rtol=2e-2, atol=2e-2)
    print("KERNEL_OK")
</pallas_src>

<mosaic_0001>
module attributes {stable_mosaic.version = 11 : i64} {
  func.func @psnet_kernel(%arg0: i32, %arg1: memref<8x16xf32, #tpu.memory_space<vmem>>, %arg2: memref<16x32xf32, #tpu.memory_space<vmem>>, %arg3: memref<32x256xf32, #tpu.memory_space<vmem>>, %arg4: memref<1x256xf32, #tpu.memory_space<vmem>>, %arg5: memref<1x256xf32, #tpu.memory_space<vmem>>, %arg6: memref<256x256xf32, #tpu.memory_space<vmem>>, %arg7: memref<1x256xf32, #tpu.memory_space<vmem>>, %arg8: memref<1x256xf32, #tpu.memory_space<vmem>>, %arg9: memref<256x256xf32, #tpu.memory_space<vmem>>, %arg10: memref<1x256xf32, #tpu.memory_space<vmem>>, %arg11: memref<1x256xf32, #tpu.memory_space<vmem>>, %arg12: memref<256x128xf32, #tpu.memory_space<vmem>>, %arg13: memref<1x128xf32, #tpu.memory_space<vmem>>, %arg14: memref<8x128xf32, #tpu.memory_space<vmem>>) attributes {dimension_semantics = [#tpu.dimension_semantics<parallel>], iteration_bounds = array<i64: 1>, scalar_prefetch = 0 : i64, scratch_operands = 0 : i64, tpu.core_type = #tpu.core_type<tc>, window_params = [{transform_indices = @transform_0, window_bounds = array<i64: 8, 16>}, {pipeline_mode = #tpu.pipeline_mode<synchronous>, transform_indices = @transform_1, window_bounds = array<i64: 16, 32>}, {pipeline_mode = #tpu.pipeline_mode<synchronous>, transform_indices = @transform_2, window_bounds = array<i64: 32, 256>}, {pipeline_mode = #tpu.pipeline_mode<synchronous>, transform_indices = @transform_3, window_bounds = array<i64: 1, 256>}, {pipeline_mode = #tpu.pipeline_mode<synchronous>, transform_indices = @transform_4, window_bounds = array<i64: 1, 256>}, {pipeline_mode = #tpu.pipeline_mode<synchronous>, transform_indices = @transform_5, window_bounds = array<i64: 256, 256>}, {pipeline_mode = #tpu.pipeline_mode<synchronous>, transform_indices = @transform_6, window_bounds = array<i64: 1, 256>}, {pipeline_mode = #tpu.pipeline_mode<synchronous>, transform_indices = @transform_7, window_bounds = array<i64: 1, 256>}, {pipeline_mode = #tpu.pipeline_mode<synchronous>, transform_indices = @transform_8, window_bounds = array<i64: 256, 256>}, {pipeline_mode = #tpu.pipeline_mode<synchronous>, transform_indices = @transform_9, window_bounds = array<i64: 1, 256>}, {pipeline_mode = #tpu.pipeline_mode<synchronous>, transform_indices = @transform_10, window_bounds = array<i64: 1, 256>}, {pipeline_mode = #tpu.pipeline_mode<synchronous>, transform_indices = @transform_11, window_bounds = array<i64: 256, 128>}, {pipeline_mode = #tpu.pipeline_mode<synchronous>, transform_indices = @transform_12, window_bounds = array<i64: 1, 128>}, {transform_indices = @transform_13, window_bounds = array<i64: 8, 128>}]} {
    %c0 = arith.constant 0 : index
    %c0_0 = arith.constant 0 : index
    %0 = vector.load %arg1[%c0, %c0_0] : memref<8x16xf32, #tpu.memory_space<vmem>>, vector<8x16xf32>
    %c0_1 = arith.constant 0 : index
    %c0_2 = arith.constant 0 : index
    %1 = vector.load %arg2[%c0_1, %c0_2] : memref<16x32xf32, #tpu.memory_space<vmem>>, vector<16x32xf32>
    %cst = arith.constant dense<0.000000e+00> : vector<8x32xf32>
    %2 = tpu.matmul %0, %1, %cst {dimension_numbers = #tpu.dot_dimension_numbers<[1], [0], [0], [1], [0, 0, 1, 1], [], []>} : vector<8x16xf32>, vector<16x32xf32>, vector<8x32xf32> -> vector<8x32xf32>
    %c0_3 = arith.constant 0 : index
    %c0_4 = arith.constant 0 : index
    %3 = vector.load %arg3[%c0_3, %c0_4] : memref<32x256xf32, #tpu.memory_space<vmem>>, vector<32x256xf32>
    %cst_5 = arith.constant dense<0.000000e+00> : vector<8x256xf32>
    %4 = tpu.matmul %2, %3, %cst_5 {dimension_numbers = #tpu.dot_dimension_numbers<[1], [0], [0], [1], [0, 0, 1, 1], [], []>} : vector<8x32xf32>, vector<32x256xf32>, vector<8x256xf32> -> vector<8x256xf32>
    %c0_6 = arith.constant 0 : index
    %c0_7 = arith.constant 0 : index
    %5 = vector.load %arg4[%c0_6, %c0_7] : memref<1x256xf32, #tpu.memory_space<vmem>>, vector<1x256xf32>
    %6 = vector.broadcast %5 : vector<1x256xf32> to vector<8x256xf32>
    %7 = arith.mulf %4, %6 : vector<8x256xf32>
    %c0_8 = arith.constant 0 : index
    %c0_9 = arith.constant 0 : index
    %8 = vector.load %arg5[%c0_8, %c0_9] : memref<1x256xf32, #tpu.memory_space<vmem>>, vector<1x256xf32>
    %9 = vector.broadcast %8 : vector<1x256xf32> to vector<8x256xf32>
    %10 = arith.addf %7, %9 : vector<8x256xf32>
    %cst_10 = arith.constant 0.000000e+00 : f32
    %11 = vector.broadcast %cst_10 : f32 to vector<8x256xf32>
    %12 = arith.maximumf %10, %11 : vector<8x256xf32>
    %c0_11 = arith.constant 0 : index
    %c0_12 = arith.constant 0 : index
    %13 = vector.load %arg6[%c0_11, %c0_12] : memref<256x256xf32, #tpu.memory_space<vmem>>, vector<256x256xf32>
    %cst_13 = arith.constant dense<0.000000e+00> : vector<8x256xf32>
    %14 = tpu.matmul %12, %13, %cst_13 {dimension_numbers = #tpu.dot_dimension_numbers<[1], [0], [0], [1], [0, 0, 1, 1], [], []>} : vector<8x256xf32>, vector<256x256xf32>, vector<8x256xf32> -> vector<8x256xf32>
    %c0_14 = arith.constant 0 : index
    %c0_15 = arith.constant 0 : index
    %15 = vector.load %arg7[%c0_14, %c0_15] : memref<1x256xf32, #tpu.memory_space<vmem>>, vector<1x256xf32>
    %16 = vector.broadcast %15 : vector<1x256xf32> to vector<8x256xf32>
    %17 = arith.mulf %14, %16 : vector<8x256xf32>
    %c0_16 = arith.constant 0 : index
    %c0_17 = arith.constant 0 : index
    %18 = vector.load %arg8[%c0_16, %c0_17] : memref<1x256xf32, #tpu.memory_space<vmem>>, vector<1x256xf32>
    %19 = vector.broadcast %18 : vector<1x256xf32> to vector<8x256xf32>
    %20 = arith.addf %17, %19 : vector<8x256xf32>
    %cst_18 = arith.constant 0.000000e+00 : f32
    %21 = vector.broadcast %cst_18 : f32 to vector<8x256xf32>
    %22 = arith.maximumf %20, %21 : vector<8x256xf32>
    %c0_19 = arith.constant 0 : index
    %c0_20 = arith.constant 0 : index
    %23 = vector.load %arg9[%c0_19, %c0_20] : memref<256x256xf32, #tpu.memory_space<vmem>>, vector<256x256xf32>
    %cst_21 = arith.constant dense<0.000000e+00> : vector<8x256xf32>
    %24 = tpu.matmul %22, %23, %cst_21 {dimension_numbers = #tpu.dot_dimension_numbers<[1], [0], [0], [1], [0, 0, 1, 1], [], []>} : vector<8x256xf32>, vector<256x256xf32>, vector<8x256xf32> -> vector<8x256xf32>
    %c0_22 = arith.constant 0 : index
    %c0_23 = arith.constant 0 : index
    %25 = vector.load %arg10[%c0_22, %c0_23] : memref<1x256xf32, #tpu.memory_space<vmem>>, vector<1x256xf32>
    %26 = vector.broadcast %25 : vector<1x256xf32> to vector<8x256xf32>
    %27 = arith.mulf %24, %26 : vector<8x256xf32>
    %c0_24 = arith.constant 0 : index
    %c0_25 = arith.constant 0 : index
    %28 = vector.load %arg11[%c0_24, %c0_25] : memref<1x256xf32, #tpu.memory_space<vmem>>, vector<1x256xf32>
    %29 = vector.broadcast %28 : vector<1x256xf32> to vector<8x256xf32>
    %30 = arith.addf %27, %29 : vector<8x256xf32>
    %cst_26 = arith.constant 0.000000e+00 : f32
    %31 = vector.broadcast %cst_26 : f32 to vector<8x256xf32>
    %32 = arith.maximumf %30, %31 : vector<8x256xf32>
    %c0_27 = arith.constant 0 : index
    %c0_28 = arith.constant 0 : index
    %33 = vector.load %arg12[%c0_27, %c0_28] : memref<256x128xf32, #tpu.memory_space<vmem>>, vector<256x128xf32>
    %cst_29 = arith.constant dense<0.000000e+00> : vector<8x128xf32>
    %34 = tpu.matmul %32, %33, %cst_29 {dimension_numbers = #tpu.dot_dimension_numbers<[1], [0], [0], [1], [0, 0, 1, 1], [], []>} : vector<8x256xf32>, vector<256x128xf32>, vector<8x128xf32> -> vector<8x128xf32>
    %c0_30 = arith.constant 0 : index
    %c0_31 = arith.constant 0 : index
    %35 = vector.load %arg13[%c0_30, %c0_31] : memref<1x128xf32, #tpu.memory_space<vmem>>, vector<1x128xf32>
    %36 = vector.broadcast %35 : vector<1x128xf32> to vector<8x128xf32>
    %37 = arith.addf %34, %36 : vector<8x128xf32>
    %c0_32 = arith.constant 0 : index
    %c0_33 = arith.constant 0 : index
    %38 = vector.load %arg14[%c0_32, %c0_33] : memref<8x128xf32, #tpu.memory_space<vmem>>, vector<8x128xf32>
    tpu.vector_store %arg14[%c0_32, %c0_33], %37 {strides = array<i32>} : memref<8x128xf32, #tpu.memory_space<vmem>>, vector<8x128xf32>,
    return
  }
  func.func @transform_0(%arg0: i32) -> (i32, i32) {
    %c0_i32 = arith.constant 0 : i32
    %c0_i32_0 = arith.constant 0 : i32
    return %arg0, %c0_i32 : i32, i32
  }
  func.func @transform_1(%arg0: i32) -> (i32, i32) {
    %c0_i32 = arith.constant 0 : i32
    %c0_i32_0 = arith.constant 0 : i32
    %c0_i32_1 = arith.constant 0 : i32
    return %c0_i32, %c0_i32_0 : i32, i32
  }
  func.func @transform_2(%arg0: i32) -> (i32, i32) {
    %c0_i32 = arith.constant 0 : i32
    %c0_i32_0 = arith.constant 0 : i32
    %c0_i32_1 = arith.constant 0 : i32
    return %c0_i32, %c0_i32_0 : i32, i32
  }
  func.func @transform_3(%arg0: i32) -> (i32, i32) {
    %c0_i32 = arith.constant 0 : i32
    %c0_i32_0 = arith.constant 0 : i32
    %c0_i32_1 = arith.constant 0 : i32
    return %c0_i32, %c0_i32_0 : i32, i32
  }
  func.func @transform_4(%arg0: i32) -> (i32, i32) {
    %c0_i32 = arith.constant 0 : i32
    %c0_i32_0 = arith.constant 0 : i32
    %c0_i32_1 = arith.constant 0 : i32
    return %c0_i32, %c0_i32_0 : i32, i32
  }
  func.func @transform_5(%arg0: i32) -> (i32, i32) {
    %c0_i32 = arith.constant 0 : i32
    %c0_i32_0 = arith.constant 0 : i32
    %c0_i32_1 = arith.constant 0 : i32
    return %c0_i32, %c0_i32_0 : i32, i32
  }
  func.func @transform_6(%arg0: i32) -> (i32, i32) {
    %c0_i32 = arith.constant 0 : i32
    %c0_i32_0 = arith.constant 0 : i32
    %c0_i32_1 = arith.constant 0 : i32
    return %c0_i32, %c0_i32_0 : i32, i32
  }
  func.func @transform_7(%arg0: i32) -> (i32, i32) {
    %c0_i32 = arith.constant 0 : i32
    %c0_i32_0 = arith.constant 0 : i32
    %c0_i32_1 = arith.constant 0 : i32
    return %c0_i32, %c0_i32_0 : i32, i32
  }
  func.func @transform_8(%arg0: i32) -> (i32, i32) {
    %c0_i32 = arith.constant 0 : i32
    %c0_i32_0 = arith.constant 0 : i32
    %c0_i32_1 = arith.constant 0 : i32
    return %c0_i32, %c0_i32_0 : i32, i32
  }
  func.func @transform_9(%arg0: i32) -> (i32, i32) {
    %c0_i32 = arith.constant 0 : i32
    %c0_i32_0 = arith.constant 0 : i32
    %c0_i32_1 = arith.constant 0 : i32
    return %c0_i32, %c0_i32_0 : i32, i32
  }
  func.func @transform_10(%arg0: i32) -> (i32, i32) {
    %c0_i32 = arith.constant 0 : i32
    %c0_i32_0 = arith.constant 0 : i32
    %c0_i32_1 = arith.constant 0 : i32
    return %c0_i32, %c0_i32_0 : i32, i32
  }
  func.func @transform_11(%arg0: i32) -> (i32, i32) {
    %c0_i32 = arith.constant 0 : i32
    %c0_i32_0 = arith.constant 0 : i32
    %c0_i32_1 = arith.constant 0 : i32
    return %c0_i32, %c0_i32_0 : i32, i32
  }
  func.func @transform_12(%arg0: i32) -> (i32, i32) {
    %c0_i32 = arith.constant 0 : i32
    %c0_i32_0 = arith.constant 0 : i32
    %c0_i32_1 = arith.constant 0 : i32
    return %c0_i32, %c0_i32_0 : i32, i32
  }
  func.func @transform_13(%arg0: i32) -> (i32, i32) {
    %c0_i32 = arith.constant 0 : i32
    %c0_i32_0 = arith.constant 0 : i32
    return %arg0, %c0_i32 : i32, i32
  }
}

</mosaic_0001>

<bundles_post_ra>
// kernel: psnet_forward.1
= control target key start
LH: loop header
LB: loop body
LE: loop exit
PB: predicated region body
PF: predicated region fallthrough
CT: control target
= control target key end

     0   :  { %18 = vsyncpa [#allocation3], 0  ;;  %s1021_s0 = inlined_call_operand.vmem [shape: f32[8,16], index: 0, kind: input, shape index: {}]   ;;  %s1022_s1 = inlined_call_operand.vmem [shape: f32[16,32], index: 1, kind: input, shape index: {}]   ;;  %s1023_s2 = inlined_call_operand.hbm [shape: f32[32,256], index: 2, kind: input, shape index: {}]   ;;  %s1024_s3 = inlined_call_operand.vmem [shape: f32[1,256], index: 3, kind: input, shape index: {}]   ;;  %s1025_s4 = inlined_call_operand.vmem [shape: f32[1,256], index: 4, kind: input, shape index: {}]   ;;  %s1026_s5 = inlined_call_operand.hbm [shape: f32[256,256], index: 5, kind: input, shape index: {}]   ;;  %s1027_s6 = inlined_call_operand.vmem [shape: f32[1,256], index: 6, kind: input, shape index: {}]   ;;  %s1028_s7 = inlined_call_operand.vmem [shape: f32[1,256], index: 7, kind: input, shape index: {}]   ;;  %s1029_s8 = inlined_call_operand.hbm [shape: f32[256,256], index: 8, kind: input, shape index: {}]   ;;  %s1030_s9 = inlined_call_operand.vmem [shape: f32[1,256], index: 9, kind: input, shape index: {}]   ;;  %s1031_s10 = inlined_call_operand.vmem [shape: f32[1,256], index: 10, kind: input, shape index: {}]   ;;  %s1032_s11 = inlined_call_operand.hbm [shape: f32[256,128], index: 11, kind: input, shape index: {}]   ;;  %s1033_s12 = inlined_call_operand.vmem [shape: f32[1,128], index: 12, kind: input, shape index: {}]   ;;  %s1034_s13 = inlined_call_operand.vmem [shape: f32[8,128], index: 13, kind: output, shape index: {}]  }
   0x1   :  { %19 = vsyncpa [#allocation5], 0 }
   0x2   :  { %20 = vsyncpa [#allocation8], 0  ;;  %s880_s25 = smov [#allocation4]   ;;  %s881_s27 = smov [#allocation2]  }
   0x3   :  { %s46_s26 = sshll.u32 %s880_s25, 4  ;;  %s30_s28 = sshll.u32 %s881_s27, 4  ;;  %s47_s26 = int_to_ptr.vmem [resolvable:$true] %s46_s26  ;;  %s31_s28 = int_to_ptr.vmem [resolvable:$true] %s30_s28 }
   0x4   :  { %s802_s29 = scalar_lea.vmem %s47_s26, 8192  ;;  %p807_p1 = scmp.lt.s32.totalorder %s47_s26, %s47_s26 }
   0x5   :  { %p803_p0 = scmp.ne.s32.totalorder %s47_s26, %s802_s29  ;;  %p808_p2 = scmp.lt.s32.totalorder %s802_s29, %s802_s29 }
   0x7   :  { %p809_p3 = por %p808_p2, %p807_p1 }
   0x9   :  { %p810_p4 = pnand %p809_p3, %p803_p0 }
   0xb   :  { %813 = shalt.err (!%p810_p4)
}
   0xc   :  { %s882_s30 = smov 256   ;;  %s883_s14 = smov 16  }
   0xd   :  { %52 = dma.hbm_to_vmem [thread:$0]  %s1026_s5, 8192, %s47_s26, [#allocation5], %s882_s30, %s882_s30, %s883_s14  }
   0xe   :  { %s822_s17 = scalar_lea.vmem %s31_s28, 1024  ;;  %p827_p6 = scmp.lt.s32.totalorder %s31_s28, %s31_s28 }
   0xf   :  { %p823_p5 = scmp.ne.s32.totalorder %s31_s28, %s822_s17  ;;  %p828_p7 = scmp.lt.s32.totalorder %s822_s17, %s822_s17 }
  0x11   :  { %p829_p8 = por %p828_p7, %p827_p6 }
  0x13   :  { %p830_p9 = pnand %p829_p8, %p823_p5 }
  0x15   :  { %833 = shalt.err (!%p830_p9)
}
  0x16   :  { %36 = dma.hbm_to_vmem [thread:$0]  %s1023_s2, 1024, %s31_s28, [#allocation3], %s882_s30, %s882_s30, %s883_s14  }
  0x17   :  { %s884_s20 = smov [#allocation6]   ;;  %s885_s22 = smov [#allocation7]  }
  0x18   :  { %s62_s21 = sshll.u32 %s884_s20, 4  ;;  %s78_s23 = sshll.u32 %s885_s22, 4  ;;  %s63_s21 = int_to_ptr.vmem [resolvable:$true] %s62_s21  ;;  %s79_s23 = int_to_ptr.vmem [resolvable:$true] %s78_s23 }
  0x19   :  { %s842_s24 = scalar_lea.vmem %s63_s21, 8192  ;;  %p847_p11 = scmp.lt.s32.totalorder %s63_s21, %s63_s21 }
  0x1a   :  { %p843_p10 = scmp.ne.s32.totalorder %s63_s21, %s842_s24  ;;  %p848_p12 = scmp.lt.s32.totalorder %s842_s24, %s842_s24 }
  0x1c   :  { %p849_p13 = por %p848_p12, %p847_p11 }
  0x1e   :  { %p850_p0 = pnand %p849_p13, %p843_p10 }
  0x20   :  { %853 = shalt.err (!%p850_p0)
}
  0x21   :  { %68 = dma.hbm_to_vmem [thread:$0]  %s1029_s8, 8192, %s63_s21, [#allocation5], %s882_s30, %s882_s30, %s883_s14  }
  0x22   :  { %s862_s26 = scalar_lea.vmem %s79_s23, 4096  ;;  %p867_p2 = scmp.lt.s32.totalorder %s79_s23, %s79_s23 }
  0x23   :  { %p863_p1 = scmp.ne.s32.totalorder %s79_s23, %s862_s26  ;;  %p868_p3 = scmp.lt.s32.totalorder %s862_s26, %s862_s26 }
  0x25   :  { %p869_p4 = por %p868_p3, %p867_p2 }
  0x27   :  { %p870_p5 = pnand %p869_p4, %p863_p1 }
  0x29   :  { %873 = shalt.err (!%p870_p5)
}
  0x2a   :  { %s886_s2 = smov 128   ;;  %s887_s27 = smov 8  }
  0x2b   :  { %84 = dma.hbm_to_vmem [thread:$0]  %s1032_s11, 4096, %s79_s23, [#allocation8], %s886_s2, %s886_s2, %s887_s27  }
  0x2c   :  { %874 = dma.done.wait [#allocation3], 1024  }
  0x2d   :  { %875 = vsyncadd [#allocation3], 4294966272 }
  0x2e   :  { %876 = dma.done.wait [#allocation5], 16384  }
  0x2f   :  { %877 = vsyncadd [#allocation5], 4294950912 }
  0x30   :  { %878 = dma.done.wait [#allocation8], 4096  }
  0x31   :  { %879 = vsyncadd [#allocation8], 4294963200  ;;  %v888_v0 = vmov 0.0   ;;  %vm889_vm0 = vmmov 0   ;;  %v101_v1 = vld [vmem:[%s1022_s1 + $0x8] sm:$0xff]  ;;  %v100_v2 = vld [vmem:[%s1022_s1] sm:$0xff] }
  0x32   :  { %777 = vmatprep.subr.mxu1 %v888_v0  ;;  %781 = vmatprep.mubr.msk.f32.mxu1 %vm889_vm0, %v888_v0  ;;  %v99_v3 = vld [vmem:[%s1021_s0] sm:$0xff]  ;;  %vm102_vm1 = vcmask 130048   ;;  %v183_v4 = vld [vmem:[#allocation2 + $0x38] sm:$0xff]  ;;  %v182_v5 = vld [vmem:[#allocation2 + $0x30] sm:$0xff]  ;;  %vm184_vm2 = vcmask 261120  }
  0x33   :  { %778 = vmatpush3.msra.mxu1 %v101_v1  ;;  %v181_v6 = vld [vmem:[#allocation2 + $0x28] sm:$0xff]  ;;  %v180_v7 = vld [vmem:[#allocation2 + $0x20] sm:$0xff]  ;;  %v179_v8 = vld [vmem:[#allocation2 + $0x18] sm:$0xff] }
  0x34   :  { %779 = vmatprep.subr.mxu1 %v888_v0  ;;  %v178_v9 = vld [vmem:[#allocation2 + $0x10] sm:$0xff]  ;;  %v177_v10 = vld [vmem:[#allocation2 + $0x8] sm:$0xff]  ;;  %v176_v11 = vld [vmem:[#allocation2] sm:$0xff] }
  0x35   :  { %780 = vmatpush3.msra.mxu1 %v100_v2  ;;  %v320_v12 = vld [vmem:[#allocation4 + $0xf8] sm:$0xff]  ;;  %v319_v13 = vld [vmem:[#allocation4 + $0xf0] sm:$0xff]  ;;  %v318_v14 = vld [vmem:[#allocation4 + $0xe8] sm:$0xff] }
  0x36   :  { %782 = vmatmul.mubr.msk.f32.vlgmr.msra.gmra.mxu1 %vm102_vm1, %v99_v3  ;;  %212 = vmatprep.subr.mxu1 %v183_v4  ;;  %v317_v15 = vld [vmem:[#allocation4 + $0xe0] sm:$0xff]  ;;  %v316_v16 = vld [vmem:[#allocation4 + $0xd8] sm:$0xff]  ;;  %v315_v17 = vld [vmem:[#allocation4 + $0xd0] sm:$0xff] }
  0x37   :  { %213 = vmatpush1.msra.mxu1 %v182_v5  ;;  %252 = vmatprep.mubr.f32.mxu1 %v888_v0  ;;  %v314_v18 = vld [vmem:[#allocation4 + $0xc8] sm:$0xff]  ;;  %v313_v19 = vld [vmem:[#allocation4 + $0xc0] sm:$0xff]  ;;  %v312_v20 = vld [vmem:[#allocation4 + $0xb8] sm:$0xff] }
  0x38   :  { %214 = vmatprep.subr.mxu1 %v181_v6  ;;  %353 = vmatprep.subr.mxu0 %v320_v12  ;;  %v311_v21 = vld [vmem:[#allocation4 + $0xb0] sm:$0xff]  ;;  %v310_v22 = vld [vmem:[#allocation4 + $0xa8] sm:$0xff]  ;;  %v309_v23 = vld [vmem:[#allocation4 + $0xa0] sm:$0xff] }
  0x39   :  { %215 = vmatpush1.msra.mxu1 %v180_v7  ;;  %354 = vmatpush1.msra.mxu0 %v319_v13  ;;  %v308_v24 = vld [vmem:[#allocation4 + $0x98] sm:$0xff]  ;;  %v307_v25 = vld [vmem:[#allocation4 + $0x90] sm:$0xff]  ;;  %v306_v26 = vld [vmem:[#allocation4 + $0x88] sm:$0xff] }
  0x3a   :  { %216 = vmatprep.subr.mxu1 %v179_v8  ;;  %355 = vmatprep.subr.mxu0 %v318_v14  ;;  %v305_v27 = vld [vmem:[#allocation4 + $0x80] sm:$0xff]  ;;  %v304_v28 = vld [vmem:[#allocation4 + $0x78] sm:$0xff]  ;;  %v303_v29 = vld [vmem:[#allocation4 + $0x70] sm:$0xff] }
  0x3b   :  { %217 = vmatpush1.msra.mxu1 %v178_v9  ;;  %356 = vmatpush1.msra.mxu0 %v317_v15  ;;  %v302_v30 = vld [vmem:[#allocation4 + $0x68] sm:$0xff]  ;;  %v301_v31 = vld [vmem:[#allocation4 + $0x60] sm:$0xff]  ;;  %v300_v32 = vld [vmem:[#allocation4 + $0x58] sm:$0xff] }
  0x3c   :  { %218 = vmatprep.subr.mxu1 %v177_v10  ;;  %357 = vmatprep.subr.mxu0 %v316_v16  ;;  %v299_v33 = vld [vmem:[#allocation4 + $0x50] sm:$0xff]  ;;  %v298_v34 = vld [vmem:[#allocation4 + $0x48] sm:$0xff]  ;;  %v297_v35 = vld [vmem:[#allocation4 + $0x40] sm:$0xff] }
  0x3d   :  { %219 = vmatpush1.msra.mxu1 %v176_v11  ;;  %358 = vmatpush1.msra.mxu0 %v315_v17  ;;  %v296_v36 = vld [vmem:[#allocation4 + $0x38] sm:$0xff]  ;;  %v295_v37 = vld [vmem:[#allocation4 + $0x30] sm:$0xff]  ;;  %v294_v38 = vld [vmem:[#allocation4 + $0x28] sm:$0xff] }
  0x3e   :  { %359 = vmatprep.subr.mxu0 %v314_v18  ;;  %v293_v39 = vld [vmem:[#allocation4 + $0x20] sm:$0xff]  ;;  %v292_v40 = vld [vmem:[#allocation4 + $0x18] sm:$0xff]  ;;  %v291_v41 = vld [vmem:[#allocation4 + $0x10] sm:$0xff] }
  0x3f   :  { %360 = vmatpush1.msra.mxu0 %v313_v19  ;;  %v290_v42 = vld [vmem:[#allocation4 + $0x8] sm:$0xff]  ;;  %v289_v43 = vld [vmem:[#allocation4] sm:$0xff]  ;;  %v352_v44 = vld [vmem:[#allocation4 + $0x1f8] sm:$0xff] }
  0x40   :  { %361 = vmatprep.subr.mxu0 %v312_v20  ;;  %v351_v45 = vld [vmem:[#allocation4 + $0x1f0] sm:$0xff]  ;;  %v350_v46 = vld [vmem:[#allocation4 + $0x1e8] sm:$0xff]  ;;  %v349_v47 = vld [vmem:[#allocation4 + $0x1e0] sm:$0xff] }
  0x41   :  { %362 = vmatpush1.msra.mxu0 %v311_v21  ;;  %v348_v48 = vld [vmem:[#allocation4 + $0x1d8] sm:$0xff]  ;;  %v347_v49 = vld [vmem:[#allocation4 + $0x1d0] sm:$0xff]  ;;  %v346_v50 = vld [vmem:[#allocation4 + $0x1c8] sm:$0xff] }
  0x42   :  { %363 = vmatprep.subr.mxu0 %v310_v22  ;;  %v345_v51 = vld [vmem:[#allocation4 + $0x1c0] sm:$0xff]  ;;  %v344_v52 = vld [vmem:[#allocation4 + $0x1b8] sm:$0xff]  ;;  %v343_v53 = vld [vmem:[#allocation4 + $0x1b0] sm:$0xff] }
  0x43   :  { %364 = vmatpush1.msra.mxu0 %v309_v23  ;;  %v342_v54 = vld [vmem:[#allocation4 + $0x1a8] sm:$0xff]  ;;  %v341_v55 = vld [vmem:[#allocation4 + $0x1a0] sm:$0xff]  ;;  %v340_v56 = vld [vmem:[#allocation4 + $0x198] sm:$0xff] }
  0x44   :  { %365 = vmatprep.subr.mxu0 %v308_v24  ;;  %v339_v57 = vld [vmem:[#allocation4 + $0x190] sm:$0xff]  ;;  %v338_v58 = vld [vmem:[#allocation4 + $0x188] sm:$0xff]  ;;  %v337_v59 = vld [vmem:[#allocation4 + $0x180] sm:$0xff] }
  0x45   :  { %366 = vmatpush1.msra.mxu0 %v307_v25  ;;  %v336_v60 = vld [vmem:[#allocation4 + $0x178] sm:$0xff]  ;;  %v335_v61 = vld [vmem:[#allocation4 + $0x170] sm:$0xff]  ;;  %v334_v62 = vld [vmem:[#allocation4 + $0x168] sm:$0xff] }
  0x46   :  { %367 = vmatprep.subr.mxu0 %v306_v26  ;;  %v333_v63 = vld [vmem:[#allocation4 + $0x160] sm:$0xff]  ;;  %v332_v0 = vld [vmem:[#allocation4 + $0x158] sm:$0xff]  ;;  %v331_v1 = vld [vmem:[#allocation4 + $0x150] sm:$0xff] }
  0x47   :  { %368 = vmatpush1.msra.mxu0 %v305_v27  ;;  %v330_v4 = vld [vmem:[#allocation4 + $0x148] sm:$0xff]  ;;  %v329_v5 = vld [vmem:[#allocation4 + $0x140] sm:$0xff]  ;;  %v328_v6 = vld [vmem:[#allocation4 + $0x138] sm:$0xff] }
  0x48   :  { %369 = vmatprep.subr.mxu0 %v304_v28  ;;  %v327_v7 = vld [vmem:[#allocation4 + $0x130] sm:$0xff]  ;;  %v326_v8 = vld [vmem:[#allocation4 + $0x128] sm:$0xff]  ;;  %v325_v9 = vld [vmem:[#allocation4 + $0x120] sm:$0xff] }
  0x49   :  { %370 = vmatpush1.msra.mxu0 %v303_v29  ;;  %v324_v10 = vld [vmem:[#allocation4 + $0x118] sm:$0xff]  ;;  %v323_v11 = vld [vmem:[#allocation4 + $0x110] sm:$0xff]  ;;  %v322_v12 = vld [vmem:[#allocation4 + $0x108] sm:$0xff] }
  0x4a   :  { %371 = vmatprep.subr.mxu0 %v302_v30  ;;  %v321_v13 = vld [vmem:[#allocation4 + $0x100] sm:$0xff]  ;;  %v485_v14 = vld [vmem:[#allocation6 + $0xf8] sm:$0xff]  ;;  %v484_v15 = vld [vmem:[#allocation6 + $0xf0] sm:$0xff] }
  0x4b   :  { %372 = vmatpush1.msra.mxu0 %v301_v31  ;;  %v483_v16 = vld [vmem:[#allocation6 + $0xe8] sm:$0xff]  ;;  %518 = vmatprep.subr.mxu1 %v485_v14  ;;  %v482_v17 = vld [vmem:[#allocation6 + $0xe0] sm:$0xff]  ;;  %v481_v18 = vld [vmem:[#allocation6 + $0xd8] sm:$0xff] }
  0x4c   :  { %373 = vmatprep.subr.mxu0 %v300_v32  ;;  %v480_v19 = vld [vmem:[#allocation6 + $0xd0] sm:$0xff]  ;;  %v479_v20 = vld [vmem:[#allocation6 + $0xc8] sm:$0xff]  ;;  %v478_v21 = vld [vmem:[#allocation6 + $0xc0] sm:$0xff] }
  0x4d   :  { %374 = vmatpush1.msra.mxu0 %v299_v33  ;;  %v477_v22 = vld [vmem:[#allocation6 + $0xb8] sm:$0xff]  ;;  %v476_v23 = vld [vmem:[#allocation6 + $0xb0] sm:$0xff]  ;;  %v475_v24 = vld [vmem:[#allocation6 + $0xa8] sm:$0xff] }
  0x4e   :  { %375 = vmatprep.subr.mxu0 %v298_v34  ;;  %v474_v25 = vld [vmem:[#allocation6 + $0xa0] sm:$0xff]  ;;  %v473_v26 = vld [vmem:[#allocation6 + $0x98] sm:$0xff]  ;;  %v472_v27 = vld [vmem:[#allocation6 + $0x90] sm:$0xff] }
  0x4f   :  { %376 = vmatpush1.msra.mxu0 %v297_v35  ;;  %v471_v28 = vld [vmem:[#allocation6 + $0x88] sm:$0xff]  ;;  %v470_v29 = vld [vmem:[#allocation6 + $0x80] sm:$0xff]  ;;  %v469_v30 = vld [vmem:[#allocation6 + $0x78] sm:$0xff] }
  0x50   :  { %377 = vmatprep.subr.mxu0 %v296_v36  ;;  %v468_v31 = vld [vmem:[#allocation6 + $0x70] sm:$0xff]  ;;  %v467_v32 = vld [vmem:[#allocation6 + $0x68] sm:$0xff]  ;;  %v466_v33 = vld [vmem:[#allocation6 + $0x60] sm:$0xff] }
  0x51   :  { %378 = vmatpush1.msra.mxu0 %v295_v37  ;;  %v465_v34 = vld [vmem:[#allocation6 + $0x58] sm:$0xff]  ;;  %v464_v35 = vld [vmem:[#allocation6 + $0x50] sm:$0xff]  ;;  %v463_v36 = vld [vmem:[#allocation6 + $0x48] sm:$0xff] }
  0x52   :  { %379 = vmatprep.subr.mxu0 %v294_v38  ;;  %v462_v37 = vld [vmem:[#allocation6 + $0x40] sm:$0xff]  ;;  %v461_v38 = vld [vmem:[#allocation6 + $0x38] sm:$0xff] }
  0x53   :  { %380 = vmatpush1.msra.mxu0 %v293_v39  ;;  %v460_v39 = vld [vmem:[#allocation6 + $0x30] sm:$0xff] }
  0x54   :  { %381 = vmatprep.subr.mxu0 %v292_v40  ;;  %v459_v40 = vld [vmem:[#allocation6 + $0x28] sm:$0xff] }
  0x55   :  { %382 = vmatpush1.msra.mxu0 %v291_v41  ;;  %v458_v41 = vld [vmem:[#allocation6 + $0x20] sm:$0xff] }
  0x56   :  { %383 = vmatprep.subr.mxu0 %v290_v42  ;;  %v457_v42 = vld [vmem:[#allocation6 + $0x18] sm:$0xff] }
  0x57   :  { %384 = vmatpush1.msra.mxu0 %v289_v43  ;;  %v456_v43 = vld [vmem:[#allocation6 + $0x10] sm:$0xff] }
  0x58   :  { %385 = vmatprep.subr.mxu0 %v352_v44  ;;  %v455_v44 = vld [vmem:[#allocation6 + $0x8] sm:$0xff] }
  0x59   :  { %386 = vmatpush2.msra.mxu0 %v351_v45  ;;  %v454_v45 = vld [vmem:[#allocation6] sm:$0xff] }
  0x5a   :  { %387 = vmatprep.subr.mxu0 %v350_v46  ;;  %v517_v46 = vld [vmem:[#allocation6 + $0x1f8] sm:$0xff] }
  0x5b   :  { %388 = vmatpush2.msra.mxu0 %v349_v47  ;;  %v516_v47 = vld [vmem:[#allocation6 + $0x1f0] sm:$0xff] }
  0x5c   :  { %389 = vmatprep.subr.mxu0 %v348_v48  ;;  %v515_v48 = vld [vmem:[#allocation6 + $0x1e8] sm:$0xff] }
  0x5d   :  { %390 = vmatpush2.msra.mxu0 %v347_v49  ;;  %v514_v49 = vld [vmem:[#allocation6 + $0x1e0] sm:$0xff] }
  0x5e   :  { %391 = vmatprep.subr.mxu0 %v346_v50  ;;  %v513_v50 = vld [vmem:[#allocation6 + $0x1d8] sm:$0xff] }
  0x5f   :  { %392 = vmatpush2.msra.mxu0 %v345_v51  ;;  %v512_v51 = vld [vmem:[#allocation6 + $0x1d0] sm:$0xff] }
  0x60   :  { %393 = vmatprep.subr.mxu0 %v344_v52  ;;  %v511_v52 = vld [vmem:[#allocation6 + $0x1c8] sm:$0xff] }
  0x61   :  { %394 = vmatpush2.msra.mxu0 %v343_v53  ;;  %v510_v53 = vld [vmem:[#allocation6 + $0x1c0] sm:$0xff] }
  0x62   :  { %395 = vmatprep.subr.mxu0 %v342_v54  ;;  %v509_v54 = vld [vmem:[#allocation6 + $0x1b8] sm:$0xff] }
  0x63   :  { %396 = vmatpush2.msra.mxu0 %v341_v55  ;;  %v508_v55 = vld [vmem:[#allocation6 + $0x1b0] sm:$0xff] }
  0x64   :  { %397 = vmatprep.subr.mxu0 %v340_v56  ;;  %v507_v56 = vld [vmem:[#allocation6 + $0x1a8] sm:$0xff] }
  0x65   :  { %398 = vmatpush2.msra.mxu0 %v339_v57  ;;  %v506_v57 = vld [vmem:[#allocation6 + $0x1a0] sm:$0xff] }
  0x66   :  { %399 = vmatprep.subr.mxu0 %v338_v58  ;;  %v505_v58 = vld [vmem:[#allocation6 + $0x198] sm:$0xff] }
  0x67   :  { %400 = vmatpush2.msra.mxu0 %v337_v59  ;;  %v504_v59 = vld [vmem:[#allocation6 + $0x190] sm:$0xff] }
  0x68   :  { %401 = vmatprep.subr.mxu0 %v336_v60  ;;  %v503_v60 = vld [vmem:[#allocation6 + $0x188] sm:$0xff] }
  0x69   :  { %402 = vmatpush2.msra.mxu0 %v335_v61  ;;  %v502_v61 = vld [vmem:[#allocation6 + $0x180] sm:$0xff] }
  0x6a   :  { %403 = vmatprep.subr.mxu0 %v334_v62  ;;  %v501_v62 = vld [vmem:[#allocation6 + $0x178] sm:$0xff] }
  0x6b   :  { %404 = vmatpush2.msra.mxu0 %v333_v63  ;;  %v500_v63 = vld [vmem:[#allocation6 + $0x170] sm:$0xff] }
  0x6c   :  { %405 = vmatprep.subr.mxu0 %v332_v0  ;;  %v499_v0 = vld [vmem:[#allocation6 + $0x168] sm:$0xff] }
  0x6d   :  { %406 = vmatpush2.msra.mxu0 %v331_v1  ;;  %v498_v1 = vld [vmem:[#allocation6 + $0x160] sm:$0xff] }
  0x6e   :  { %407 = vmatprep.subr.mxu0 %v330_v4  ;;  %v261_v4 = vlaneseq }
  0x6f   :  { %408 = vmatpush2.msra.mxu0 %v329_v5 }
  0x70   :  { %409 = vmatprep.subr.mxu0 %v328_v6  ;;  %v262_v5 = vshrl.u32 %v261_v4, 7  ;;  %v639_v4 = vld [vmem:[#allocation7 + $0xa0] sm:$0xff] }
  0x71   :  { %410 = vmatpush2.msra.mxu0 %v327_v7  ;;  %v259_v7 = vld [vmem:[%s1024_s3] sm:$0x3] }
  0x72   :  { %411 = vmatprep.subr.mxu0 %v326_v8  ;;  %v981_v6 = vsub.s32 0, %v262_v5  ;;  %v986_v8 = vsub.s32 1, %v262_v5  ;;  %v623_v5 = vld [vmem:[#allocation7 + $0x20] sm:$0xff] }
  0x73   :  { %412 = vmatpush2.msra.mxu0 %v325_v9 }
  0x74   :  { %413 = vmatprep.subr.mxu0 %v324_v10  ;;  %v264_v9 = vrot.slane %v259_v7, %v981_v6  ;;  %v273_v10 = vld [vmem:[%s1025_s4] sm:$0x3] }
  0x75   :  { %414 = vmatpush2.msra.mxu0 %v323_v11  ;;  %v268_v11 = vrot.slane %v259_v7, %v986_v8  ;;  %v638_v7 = vld [vmem:[#allocation7 + $0x98] sm:$0xff] }
  0x76   :  { %415 = vmatprep.subr.mxu0 %v322_v12 }
  0x77   :  { %416 = vmatpush2.msra.mxu0 %v321_v13  ;;  %v278_v13 = vrot.slane %v273_v10, %v981_v6 }
  0xf6   :  { %v172_v2 = vpop.f32.mrf.mxu1 }
  0xf7   :  { %737 = vmatmul.mubr.msk.f32.vlgmr.msra.gmra.mxu1 %vm184_vm2, %v172_v2  ;;  %v497_v2 = vld [vmem:[#allocation6 + $0x158] sm:$0xff] }
  0xf8   :  { %v783_v3 = vpop.f32.mrf.mxu1  ;;  %519 = vmatpush1.msra.mxu1 %v484_v15  ;;  %v282_v15 = vrot.slane %v273_v10, %v986_v8  ;;  %v637_v10 = vld [vmem:[#allocation7 + $0x90] sm:$0xff] }
  0xf9   :  { %520 = vmatprep.subr.mxu1 %v483_v16  ;;  %v496_v3 = vld [vmem:[#allocation6 + $0x150] sm:$0xff] }
  0xfa   :  { %521 = vmatpush1.msra.mxu1 %v482_v17 }
  0xfb   :  { %522 = vmatprep.subr.mxu1 %v481_v18 }
  0xfc   :  { %523 = vmatpush1.msra.mxu1 %v480_v19 }
  0xfd   :  { %524 = vmatprep.subr.mxu1 %v479_v20 }
  0xfe   :  { %525 = vmatpush1.msra.mxu1 %v478_v21 }
  0xff   :  { %526 = vmatprep.subr.mxu1 %v477_v22  ;;  %v495_v22 = vld [vmem:[#allocation6 + $0x148] sm:$0xff] }
 0x100   :  { %527 = vmatpush1.msra.mxu1 %v476_v23  ;;  %v494_v23 = vld [vmem:[#allocation6 + $0x140] sm:$0xff] }
 0x101   :  { %528 = vmatprep.subr.mxu1 %v475_v24  ;;  %v493_v24 = vld [vmem:[#allocation6 + $0x138] sm:$0xff] }
 0x102   :  { %529 = vmatpush1.msra.mxu1 %v474_v25  ;;  %v492_v25 = vld [vmem:[#allocation6 + $0x130] sm:$0xff] }
 0x103   :  { %530 = vmatprep.subr.mxu1 %v473_v26  ;;  %v491_v26 = vld [vmem:[#allocation6 + $0x128] sm:$0xff] }
 0x104   :  { %531 = vmatpush1.msra.mxu1 %v472_v27  ;;  %v490_v27 = vld [vmem:[#allocation6 + $0x120] sm:$0xff] }
 0x105   :  { %532 = vmatprep.subr.mxu1 %v471_v28  ;;  %v489_v28 = vld [vmem:[#allocation6 + $0x118] sm:$0xff] }
 0x106   :  { %533 = vmatpush1.msra.mxu1 %v470_v29  ;;  %v488_v29 = vld [vmem:[#allocation6 + $0x110] sm:$0xff] }
 0x107   :  { %534 = vmatprep.subr.mxu1 %v469_v30  ;;  %v487_v30 = vld [vmem:[#allocation6 + $0x108] sm:$0xff] }
 0x108   :  { %535 = vmatpush1.msra.mxu1 %v468_v31  ;;  %v486_v31 = vld [vmem:[#allocation6 + $0x100] sm:$0xff] }
 0x109   :  { %536 = vmatprep.subr.mxu1 %v467_v32  ;;  %v650_v32 = vld [vmem:[#allocation7 + $0xf8] sm:$0xff] }
 0x10a   :  { %537 = vmatpush1.msra.mxu1 %v466_v33  ;;  %v634_v33 = vld [vmem:[#allocation7 + $0x78] sm:$0xff]  ;;  %742 = vmatprep.subr.mxu0 %v650_v32 }
 0x10b   :  { %538 = vmatprep.subr.mxu1 %v465_v34  ;;  %v649_v34 = vld [vmem:[#allocation7 + $0xf0] sm:$0xff] }
 0x10c   :  { %539 = vmatpush1.msra.mxu1 %v464_v35  ;;  %v633_v35 = vld [vmem:[#allocation7 + $0x70] sm:$0xff] }
 0x10d   :  { %540 = vmatprep.subr.mxu1 %v463_v36  ;;  %v648_v36 = vld [vmem:[#allocation7 + $0xe8] sm:$0xff] }
 0x10e   :  { %541 = vmatpush1.msra.mxu1 %v462_v37  ;;  %v632_v37 = vld [vmem:[#allocation7 + $0x68] sm:$0xff] }
 0x10f   :  { %542 = vmatprep.subr.mxu1 %v461_v38  ;;  %v647_v38 = vld [vmem:[#allocation7 + $0xe0] sm:$0xff] }
 0x110   :  { %543 = vmatpush1.msra.mxu1 %v460_v39  ;;  %v631_v39 = vld [vmem:[#allocation7 + $0x60] sm:$0xff] }
 0x111   :  { %544 = vmatprep.subr.mxu1 %v459_v40  ;;  %v646_v40 = vld [vmem:[#allocation7 + $0xd8] sm:$0xff] }
 0x112   :  { %545 = vmatpush1.msra.mxu1 %v458_v41  ;;  %v630_v41 = vld [vmem:[#allocation7 + $0x58] sm:$0xff] }
 0x113   :  { %546 = vmatprep.subr.mxu1 %v457_v42  ;;  %v645_v42 = vld [vmem:[#allocation7 + $0xd0] sm:$0xff] }
 0x114   :  { %547 = vmatpush1.msra.mxu1 %v456_v43  ;;  %v629_v43 = vld [vmem:[#allocation7 + $0x50] sm:$0xff] }
 0x115   :  { %548 = vmatprep.subr.mxu1 %v455_v44  ;;  %v644_v44 = vld [vmem:[#allocation7 + $0xc8] sm:$0xff] }
 0x116   :  { %549 = vmatpush1.msra.mxu1 %v454_v45  ;;  %v628_v45 = vld [vmem:[#allocation7 + $0x48] sm:$0xff] }
 0x117   :  { %550 = vmatprep.subr.mxu1 %v517_v46  ;;  %v643_v46 = vld [vmem:[#allocation7 + $0xc0] sm:$0xff] }
 0x118   :  { %551 = vmatpush2.msra.mxu1 %v516_v47  ;;  %v627_v47 = vld [vmem:[#allocation7 + $0x40] sm:$0xff] }
 0x119   :  { %552 = vmatprep.subr.mxu1 %v515_v48  ;;  %v642_v48 = vld [vmem:[#allocation7 + $0xb8] sm:$0xff] }
 0x11a   :  { %553 = vmatpush2.msra.mxu1 %v514_v49  ;;  %v626_v49 = vld [vmem:[#allocation7 + $0x38] sm:$0xff] }
 0x11b   :  { %554 = vmatprep.subr.mxu1 %v513_v50  ;;  %v641_v50 = vld [vmem:[#allocation7 + $0xb0] sm:$0xff] }
 0x11c   :  { %555 = vmatpush2.msra.mxu1 %v512_v51  ;;  %v625_v51 = vld [vmem:[#allocation7 + $0x30] sm:$0xff] }
 0x11d   :  { %556 = vmatprep.subr.mxu1 %v511_v52  ;;  %v640_v52 = vld [vmem:[#allocation7 + $0xa8] sm:$0xff] }
 0x11e   :  { %557 = vmatpush2.msra.mxu1 %v510_v53  ;;  %v624_v53 = vld [vmem:[#allocation7 + $0x28] sm:$0xff] }
 0x11f   :  { %558 = vmatprep.subr.mxu1 %v509_v54  ;;  %v424_v54 = vld [vmem:[%s1027_s6] sm:$0x3] }
 0x120   :  { %559 = vmatpush2.msra.mxu1 %v508_v55  ;;  %v429_v55 = vrot.slane %v424_v54, %v981_v6 }
 0x121   :  { %560 = vmatprep.subr.mxu1 %v507_v56  ;;  %v438_v56 = vld [vmem:[%s1028_s7] sm:$0x3] }
 0x122   :  { %561 = vmatpush2.msra.mxu1 %v506_v57  ;;  %v433_v57 = vrot.slane %v424_v54, %v986_v8 }
 0x123   :  { %562 = vmatprep.subr.mxu1 %v505_v58 }
 0x124   :  { %563 = vmatpush2.msra.mxu1 %v504_v59  ;;  %v443_v59 = vrot.slane %v438_v56, %v981_v6 }
 0x125   :  { %564 = vmatprep.subr.mxu1 %v503_v60 }
 0x126   :  { %565 = vmatpush2.msra.mxu1 %v502_v61  ;;  %v447_v61 = vrot.slane %v438_v56, %v986_v8 }
 0x127   :  { %566 = vmatprep.subr.mxu1 %v501_v62 }
 0x128   :  { %567 = vmatpush2.msra.mxu1 %v500_v63 }
 0x129   :  { %568 = vmatprep.subr.mxu1 %v499_v0 }
 0x12a   :  { %569 = vmatpush2.msra.mxu1 %v498_v1 }
 0x12b   :  { %570 = vmatprep.subr.mxu1 %v497_v2 }
 0x12c   :  { %571 = vmatpush2.msra.mxu1 %v496_v3 }
 0x12d   :  { %572 = vmatprep.subr.mxu1 %v495_v22 }
 0x12e   :  { %573 = vmatpush2.msra.mxu1 %v494_v23 }
 0x12f   :  { %574 = vmatprep.subr.mxu1 %v493_v24 }
 0x130   :  { %575 = vmatpush2.msra.mxu1 %v492_v25 }
 0x131   :  { %576 = vmatprep.subr.mxu1 %v491_v26 }
 0x132   :  { %577 = vmatpush2.msra.mxu1 %v490_v27 }
 0x133   :  { %578 = vmatprep.subr.mxu1 %v489_v28 }
 0x134   :  { %579 = vmatpush2.msra.mxu1 %v488_v29 }
 0x135   :  { %580 = vmatprep.subr.mxu1 %v487_v30 }
 0x136   :  { %581 = vmatpush2.msra.mxu1 %v486_v31  ;;  %v738_v31 = vld [vmem:[%s1033_s12] ss:$0 sm:$0xff] }
 0x1b7   :  { %v254_v12 = vpop.f32.mrf.mxu1 }
 0x1b8   :  { %v271_v14 = vmul.f32 %v264_v9, %v254_v12  ;;  %v622_v9 = vld [vmem:[#allocation7 + $0x18] sm:$0xff]  ;;  %v636_v12 = vld [vmem:[#allocation7 + $0x88] sm:$0xff] }
 0x1b9   :  { %v256_v16 = vpop.f32.mrf.mxu1 }
 0x1ba   :  { %v272_v17 = vmul.f32 %v268_v11, %v256_v16  ;;  %v285_v18 = vadd.f32 %v278_v13, %v271_v14  ;;  %v621_v11 = vld [vmem:[#allocation7 + $0x10] sm:$0xff]  ;;  %v620_v13 = vld [vmem:[#allocation7 + $0x8] sm:$0xff]  ;;  %v635_v14 = vld [vmem:[#allocation7 + $0x80] sm:$0xff] }
 0x1bb   :  { %v589_v16 = vld [vmem:[%s1030_s9] sm:$0x3] }
 0x1bc   :  { %v286_v19 = vadd.f32 %v282_v15, %v272_v17  ;;  %v287_v21 = vmax.f32 %v285_v18, 0.0  ;;  %v619_v15 = vld [vmem:[#allocation7] sm:$0xff]  ;;  %v594_v17 = vrot.slane %v589_v16, %v981_v6 }
 0x1bd   :  { %v603_v18 = vld [vmem:[%s1031_s10] sm:$0x3] }
 0x1be   :  { %v288_v20 = vmax.f32 %v286_v19, 0.0  ;;  %v598_v19 = vrot.slane %v589_v16, %v986_v8  ;;  %v612_v23 = vrot.slane %v603_v18, %v986_v8 }
 0x1c0   :  { %417 = vmatprep.mubr.f32.mxu0 %v288_v20 }
 0x1c1   :  { %418 = vmatmul.mubr.f32.vlgmr.msra.gmra.mxu0 %v287_v21  ;;  %v608_v21 = vrot.slane %v603_v18, %v981_v6 }
 0x1c2   :  { %743 = vmatpush3.msra.mxu0 %v634_v33 }
 0x1c3   :  { %744 = vmatprep.subr.mxu0 %v649_v34 }
 0x1c4   :  { %745 = vmatpush3.msra.mxu0 %v633_v35 }
 0x1c5   :  { %746 = vmatprep.subr.mxu0 %v648_v36 }
 0x1c6   :  { %747 = vmatpush3.msra.mxu0 %v632_v37 }
 0x1c7   :  { %748 = vmatprep.subr.mxu0 %v647_v38 }
 0x1c8   :  { %749 = vmatpush3.msra.mxu0 %v631_v39 }
 0x1c9   :  { %750 = vmatprep.subr.mxu0 %v646_v40 }
 0x1ca   :  { %751 = vmatpush3.msra.mxu0 %v630_v41 }
 0x1cb   :  { %752 = vmatprep.subr.mxu0 %v645_v42 }
 0x1cc   :  { %753 = vmatpush3.msra.mxu0 %v629_v43 }
 0x1cd   :  { %754 = vmatprep.subr.mxu0 %v644_v44 }
 0x1ce   :  { %755 = vmatpush3.msra.mxu0 %v628_v45 }
 0x1cf   :  { %756 = vmatprep.subr.mxu0 %v643_v46 }
 0x1d0   :  { %757 = vmatpush3.msra.mxu0 %v627_v47 }
 0x1d1   :  { %758 = vmatprep.subr.mxu0 %v642_v48 }
 0x1d2   :  { %759 = vmatpush3.msra.mxu0 %v626_v49 }
 0x1d3   :  { %760 = vmatprep.subr.mxu0 %v641_v50 }
 0x1d4   :  { %761 = vmatpush3.msra.mxu0 %v625_v51 }
 0x1d5   :  { %762 = vmatprep.subr.mxu0 %v640_v52 }
 0x1d6   :  { %763 = vmatpush3.msra.mxu0 %v624_v53 }
 0x1d7   :  { %764 = vmatprep.subr.mxu0 %v639_v4 }
 0x1d8   :  { %765 = vmatpush3.msra.mxu0 %v623_v5 }
 0x1d9   :  { %766 = vmatprep.subr.mxu0 %v638_v7 }
 0x1da   :  { %767 = vmatpush3.msra.mxu0 %v622_v9 }
 0x1db   :  { %768 = vmatprep.subr.mxu0 %v637_v10 }
 0x1dc   :  { %769 = vmatpush3.msra.mxu0 %v621_v11 }
 0x1dd   :  { %770 = vmatprep.subr.mxu0 %v636_v12 }
 0x1de   :  { %771 = vmatpush3.msra.mxu0 %v620_v13 }
 0x1df   :  { %772 = vmatprep.subr.mxu0 %v635_v14 }
 0x1e0   :  { %773 = vmatpush3.msra.mxu0 %v619_v15 }
 0x281   :  { %v419_v58 = vpop.f32.mrf.mxu0 }
 0x282   :  { %v436_v60 = vmul.f32 %v429_v55, %v419_v58 }
 0x283   :  { %v421_v62 = vpop.f32.mrf.mxu0 }
 0x284   :  { %v437_v63 = vmul.f32 %v433_v57, %v421_v62  ;;  %v450_v0 = vadd.f32 %v443_v59, %v436_v60 }
 0x286   :  { %v451_v1 = vadd.f32 %v447_v61, %v437_v63  ;;  %v452_v3 = vmax.f32 %v450_v0, 0.0 }
 0x288   :  { %v453_v2 = vmax.f32 %v451_v1, 0.0 }
 0x28a   :  { %582 = vmatprep.mubr.f32.mxu1 %v453_v2 }
 0x28b   :  { %583 = vmatmul.mubr.f32.vlgmr.msra.gmra.mxu1 %v452_v3 }
 0x34b   :  { %v584_v20 = vpop.f32.mrf.mxu1 }
 0x34c   :  { %v601_v22 = vmul.f32 %v594_v17, %v584_v20 }
 0x34d   :  { %v586_v24 = vpop.f32.mrf.mxu1 }
 0x34e   :  { %v602_v25 = vmul.f32 %v598_v19, %v586_v24  ;;  %v615_v26 = vadd.f32 %v608_v21, %v601_v22 }
 0x350   :  { %v616_v27 = vadd.f32 %v612_v23, %v602_v25  ;;  %v617_v29 = vmax.f32 %v615_v26, 0.0 }
 0x352   :  { %v618_v28 = vmax.f32 %v616_v27, 0.0 }
 0x354   :  { %722 = vmatprep.mubr.f32.mxu0 %v618_v28 }
 0x355   :  { %723 = vmatmul.mubr.f32.vlgmr.msra.gmra.mxu0 %v617_v29 }
 0x415   :  { %v774_v30 = vpop.f32.mrf.mxu0 }
 0x417   :  { %v775_v32 = vpop.f32.mrf.mxu0 }
 0x418   :  { %v776_v33 = vadd.f32 %v775_v32, %v774_v30 }
 0x41a   :  { %v725_v34 = vadd.f32 %v776_v33, %v738_v31 }
 0x41c   :  { %728 = vst [vmem:[%s1034_s13] sm:$0xff] %v725_v34 }
 0x41d   :  { %733 = vsyncpa [#allocation3], 1 }
 0x41e   :  { %734 = vsyncpa [#allocation5], 1 }
 0x41f   :  { %735 = vsyncpa [#allocation8], 1 }

</bundles_post_ra>
